<compile_context>
chip_gen: v7x
topology: tpu7x:2x2x1
jax: 0.10.0
libtpu: 0.0.40
codegen_flags: <defaults>
</compile_context>

<pallas_src>
import functools

import jax
import jax.numpy as jnp
from jax.experimental import pallas as pl
from jax.experimental.pallas import tpu as pltpu


def _round_up(x, m):
    return ((x + m - 1) // m) * m


def mlp_g_kernel(noise_ref, att_ref, w1n_ref, w1a_ref, b1_ref, w2_ref, b2_ref, o_ref):
    # noise: [TM, nz_p]   att: [TM, att_p]
    # w1n:   [nz_p, ngh_p]  w1a: [att_p, ngh_p]  b1: [1, ngh_p]
    # w2:    [ngh_p, res_p] b2:  [1, res_p]      o:  [TM, res_p]
    z1 = (
        jnp.dot(noise_ref[...], w1n_ref[...], preferred_element_type=jnp.float32)
        + jnp.dot(att_ref[...], w1a_ref[...], preferred_element_type=jnp.float32)
        + b1_ref[...]
    )
    a1 = jnp.where(z1 > 0, z1, 0.2 * z1)                     # LeakyReLU(0.2)
    a1 = a1.astype(w2_ref.dtype)                             # bf16 MXU path if enabled
    z2 = jnp.dot(a1, w2_ref[...], preferred_element_type=jnp.float32) + b2_ref[...]
    o_ref[...] = jnp.maximum(z2, 0.0).astype(o_ref.dtype)    # ReLU


def prepare_params(w1, b1, w2, b2, nz, *, compute_dtype=jnp.float32, lane=128):
    """Run ONCE at parameter-load time.

    Transposes PyTorch (out, in) weights to (in, out), splits W1^T at the concat
    boundary (noise rows vs. att rows), zero-pads feature dims to lane multiples,
    and casts weights to the compute dtype. Biases stay f32 (added post-accumulate).
    """
    ngh, d_in = w1.shape
    res = w2.shape[0]
    att_size = d_in - nz

    nz_p = _round_up(nz, lane)
    att_p = _round_up(att_size, lane)
    ngh_p = _round_up(ngh, lane)
    res_p = _round_up(res, lane)

    w1_t = w1.T  # [d_in, ngh];  rows [:nz] multiply noise, rows [nz:] multiply att
    w1n = jnp.zeros((nz_p, ngh_p), compute_dtype).at[:nz, :ngh].set(
        w1_t[:nz].astype(compute_dtype))
    w1a = jnp.zeros((att_p, ngh_p), compute_dtype).at[:att_size, :ngh].set(
        w1_t[nz:].astype(compute_dtype))
    w2t = jnp.zeros((ngh_p, res_p), compute_dtype).at[:ngh, :res].set(
        w2.T.astype(compute_dtype))
    b1p = jnp.zeros((1, ngh_p), jnp.float32).at[0, :ngh].set(b1.astype(jnp.float32))
    b2p = jnp.zeros((1, res_p), jnp.float32).at[0, :res].set(b2.astype(jnp.float32))

    meta = dict(nz=nz, att_size=att_size, ngh=ngh, res=res,
                nz_p=nz_p, att_p=att_p, ngh_p=ngh_p, res_p=res_p,
                compute_dtype=compute_dtype)
    return (w1n, w1a, b1p, w2t, b2p), meta


def mlp_g_forward(noise, att, params, meta, *, tm=256):
    """noise: [B, nz], att: [B, attSize]. params/meta from prepare_params."""
    w1n, w1a, b1p, w2t, b2p = params
    B = noise.shape[0]
    nz, att_size, res = meta["nz"], meta["att_size"], meta["res"]
    nz_p, att_p, ngh_p, res_p = meta["nz_p"], meta["att_p"], meta["ngh_p"], meta["res_p"]
    cdt = meta["compute_dtype"]
    out_dtype = noise.dtype

    # Batch tile: multiple of 8 sublanes, capped at tm; pad B to a whole tile count.
    tm_eff = min(_round_up(tm, 8), _round_up(B, 8))
    b_pad = _round_up(B, tm_eff)
    grid = (b_pad // tm_eff,)

    noise_p = jnp.zeros((b_pad, nz_p), cdt).at[:B, :nz].set(noise.astype(cdt))
    att_pd = jnp.zeros((b_pad, att_p), cdt).at[:B, :att_size].set(att.astype(cdt))

    # Advisory cost estimate for XLA's scheduler.
    flops = 2 * b_pad * ((nz_p + att_p) * ngh_p + ngh_p * res_p)
    bytes_accessed = (
        int(noise_p.size) * noise_p.dtype.itemsize
        + int(att_pd.size) * att_pd.dtype.itemsize
        + sum(int(w.size) * w.dtype.itemsize for w in (w1n, w1a, b1p, w2t, b2p))
        + b_pad * res_p * jnp.dtype(out_dtype).itemsize
    )

    # VMEM budget: double-buffered activation/output tiles + resident weights
    # (counted x2 for buffer headroom) + f32 intermediates. Clamped to 64 MiB so the
    # same setting is safe on v7x (64 MiB physical VMEM) and v5e/v6e.
    c_item = jnp.dtype(cdt).itemsize
    weight_bytes = sum(int(w.size) * w.dtype.itemsize for w in (w1n, w1a, b1p, w2t, b2p))
    io_bytes = 2 * tm_eff * (nz_p + att_p) * c_item \
        + 2 * tm_eff * res_p * jnp.dtype(out_dtype).itemsize
    scratch_bytes = tm_eff * (2 * ngh_p + res_p) * 4
    vmem_limit = int(min(64 * 1024 * 1024,
                         max(16 * 1024 * 1024,
                             2 * (2 * weight_bytes + io_bytes + scratch_bytes))))

    out_p = pl.pallas_call(
        mlp_g_kernel,
        out_shape=jax.ShapeDtypeStruct((b_pad, res_p), out_dtype),
        grid=grid,
        in_specs=[
            pl.BlockSpec((tm_eff, nz_p), lambda i: (i, 0)),    # noise tile (pipelined)
            pl.BlockSpec((tm_eff, att_p), lambda i: (i, 0)),   # att tile   (pipelined)
            pl.BlockSpec((nz_p, ngh_p), lambda i: (0, 0)),     # W1 (noise rows), resident
            pl.BlockSpec((att_p, ngh_p), lambda i: (0, 0)),    # W1 (att rows),   resident
            pl.BlockSpec((1, ngh_p), lambda i: (0, 0)),        # b1, resident
            pl.BlockSpec((ngh_p, res_p), lambda i: (0, 0)),    # W2, resident
            pl.BlockSpec((1, res_p), lambda i: (0, 0)),        # b2, resident
        ],
        out_specs=pl.BlockSpec((tm_eff, res_p), lambda i: (i, 0)),
        compiler_params=pltpu.CompilerParams(
            dimension_semantics=("parallel",),
            vmem_limit_bytes=vmem_limit,
        ),
        cost_estimate=pl.CostEstimate(
            flops=int(flops), transcendentals=0, bytes_accessed=int(bytes_accessed)),
    )(noise_p, att_pd, w1n, w1a, b1p, w2t, b2p)

    return out_p[:B, :res]


def reference_forward(noise, att, w1, b1, w2, b2):
    h = jnp.concatenate((noise, att), axis=1)
    z1 = h @ w1.T + b1
    a1 = jnp.where(z1 > 0, z1, 0.2 * z1)
    z2 = a1 @ w2.T + b2
    return jnp.maximum(z2, 0.0)


if __name__ == "__main__":
    # Small opt-like config: attSize=16, nz=16, ngh=32, resSize=64, batch=8
    att_size, nz, ngh, res_size, batch = 16, 16, 32, 64, 8

    key = jax.random.PRNGKey(0)
    k_noise, k_att, k_w1, k_w2 = jax.random.split(key, 4)

    noise = jax.random.normal(k_noise, (batch, nz), dtype=jnp.float32)
    att = jax.random.normal(k_att, (batch, att_size), dtype=jnp.float32)

    # weights_init: Linear weights ~ N(0, 0.02), biases = 0 (PyTorch (out, in) layout)
    w1 = 0.02 * jax.random.normal(k_w1, (ngh, att_size + nz), dtype=jnp.float32)
    b1 = jnp.zeros((ngh,), dtype=jnp.float32)
    w2 = 0.02 * jax.random.normal(k_w2, (res_size, ngh), dtype=jnp.float32)
    b2 = jnp.zeros((res_size,), dtype=jnp.float32)

    # One-time parameter prep (transpose / split / pad). Use compute_dtype=jnp.bfloat16
    # on v6e/v7x for MXU peak; f32 here to keep a tight numeric check.
    params, meta = prepare_params(w1, b1, w2, b2, nz, compute_dtype=jnp.float32)

    fwd = jax.jit(functools.partial(mlp_g_forward, params=params, meta=meta))
    out = jax.block_until_ready(fwd(noise, att))

    ref = reference_forward(noise, att, w1, b1, w2, b2)
    assert out.shape == (batch, res_size)
    assert jnp.allclose(out, ref, atol=1e-5, rtol=1e-5)

    print("KERNEL_OK")
</pallas_src>

<mosaic_0001>
module attributes {stable_mosaic.version = 11 : i64} {
  func.func @mlp_g_kernel(%arg0: i32, %arg1: memref<8x128xf32, #tpu.memory_space<vmem>>, %arg2: memref<8x128xf32, #tpu.memory_space<vmem>>, %arg3: memref<128x128xf32, #tpu.memory_space<vmem>>, %arg4: memref<128x128xf32, #tpu.memory_space<vmem>>, %arg5: memref<1x128xf32, #tpu.memory_space<vmem>>, %arg6: memref<128x128xf32, #tpu.memory_space<vmem>>, %arg7: memref<1x128xf32, #tpu.memory_space<vmem>>, %arg8: memref<8x128xf32, #tpu.memory_space<vmem>>) attributes {dimension_semantics = [#tpu.dimension_semantics<parallel>], iteration_bounds = array<i64: 1>, scalar_prefetch = 0 : i64, scratch_operands = 0 : i64, tpu.core_type = #tpu.core_type<tc>, window_params = [{transform_indices = @transform_0, window_bounds = array<i64: 8, 128>}, {transform_indices = @transform_1, window_bounds = array<i64: 8, 128>}, {pipeline_mode = #tpu.pipeline_mode<synchronous>, transform_indices = @transform_2, window_bounds = array<i64: 128, 128>}, {pipeline_mode = #tpu.pipeline_mode<synchronous>, transform_indices = @transform_3, window_bounds = array<i64: 128, 128>}, {pipeline_mode = #tpu.pipeline_mode<synchronous>, transform_indices = @transform_4, window_bounds = array<i64: 1, 128>}, {pipeline_mode = #tpu.pipeline_mode<synchronous>, transform_indices = @transform_5, window_bounds = array<i64: 128, 128>}, {pipeline_mode = #tpu.pipeline_mode<synchronous>, transform_indices = @transform_6, window_bounds = array<i64: 1, 128>}, {transform_indices = @transform_7, window_bounds = array<i64: 8, 128>}]} {
    %c0 = arith.constant 0 : index
    %c0_0 = arith.constant 0 : index
    %0 = vector.load %arg1[%c0, %c0_0] : memref<8x128xf32, #tpu.memory_space<vmem>>, vector<8x128xf32>
    %c0_1 = arith.constant 0 : index
    %c0_2 = arith.constant 0 : index
    %1 = vector.load %arg3[%c0_1, %c0_2] : memref<128x128xf32, #tpu.memory_space<vmem>>, vector<128x128xf32>
    %cst = arith.constant dense<0.000000e+00> : vector<8x128xf32>
    %2 = tpu.matmul %0, %1, %cst {dimension_numbers = #tpu.dot_dimension_numbers<[1], [0], [0], [1], [0, 0, 1, 1], [], []>} : vector<8x128xf32>, vector<128x128xf32>, vector<8x128xf32> -> vector<8x128xf32>
    %c0_3 = arith.constant 0 : index
    %c0_4 = arith.constant 0 : index
    %3 = vector.load %arg2[%c0_3, %c0_4] : memref<8x128xf32, #tpu.memory_space<vmem>>, vector<8x128xf32>
    %c0_5 = arith.constant 0 : index
    %c0_6 = arith.constant 0 : index
    %4 = vector.load %arg4[%c0_5, %c0_6] : memref<128x128xf32, #tpu.memory_space<vmem>>, vector<128x128xf32>
    %cst_7 = arith.constant dense<0.000000e+00> : vector<8x128xf32>
    %5 = tpu.matmul %3, %4, %cst_7 {dimension_numbers = #tpu.dot_dimension_numbers<[1], [0], [0], [1], [0, 0, 1, 1], [], []>} : vector<8x128xf32>, vector<128x128xf32>, vector<8x128xf32> -> vector<8x128xf32>
    %6 = arith.addf %2, %5 : vector<8x128xf32>
    %c0_8 = arith.constant 0 : index
    %c0_9 = arith.constant 0 : index
    %7 = vector.load %arg5[%c0_8, %c0_9] : memref<1x128xf32, #tpu.memory_space<vmem>>, vector<1x128xf32>
    %8 = vector.broadcast %7 : vector<1x128xf32> to vector<8x128xf32>
    %9 = arith.addf %6, %8 : vector<8x128xf32>
    %cst_10 = arith.constant 0.000000e+00 : f32
    %10 = vector.broadcast %cst_10 : f32 to vector<8x128xf32>
    %11 = arith.cmpf ogt, %9, %10 : vector<8x128xf32>
    %cst_11 = arith.constant 2.000000e-01 : f32
    %12 = vector.broadcast %cst_11 : f32 to vector<8x128xf32>
    %13 = arith.mulf %12, %9 : vector<8x128xf32>
    %14 = arith.select %11, %9, %13 : vector<8x128xi1>, vector<8x128xf32>
    %c0_12 = arith.constant 0 : index
    %c0_13 = arith.constant 0 : index
    %15 = vector.load %arg6[%c0_12, %c0_13] : memref<128x128xf32, #tpu.memory_space<vmem>>, vector<128x128xf32>
    %cst_14 = arith.constant dense<0.000000e+00> : vector<8x128xf32>
    %16 = tpu.matmul %14, %15, %cst_14 {dimension_numbers = #tpu.dot_dimension_numbers<[1], [0], [0], [1], [0, 0, 1, 1], [], []>} : vector<8x128xf32>, vector<128x128xf32>, vector<8x128xf32> -> vector<8x128xf32>
    %c0_15 = arith.constant 0 : index
    %c0_16 = arith.constant 0 : index
    %17 = vector.load %arg7[%c0_15, %c0_16] : memref<1x128xf32, #tpu.memory_space<vmem>>, vector<1x128xf32>
    %18 = vector.broadcast %17 : vector<1x128xf32> to vector<8x128xf32>
    %19 = arith.addf %16, %18 : vector<8x128xf32>
    %cst_17 = arith.constant 0.000000e+00 : f32
    %20 = vector.broadcast %cst_17 : f32 to vector<8x128xf32>
    %21 = arith.maximumf %19, %20 : vector<8x128xf32>
    %c0_18 = arith.constant 0 : index
    %c0_19 = arith.constant 0 : index
    %22 = vector.load %arg8[%c0_18, %c0_19] : memref<8x128xf32, #tpu.memory_space<vmem>>, vector<8x128xf32>
    tpu.vector_store %arg8[%c0_18, %c0_19], %21 {strides = array<i32>} : memref<8x128xf32, #tpu.memory_space<vmem>>, vector<8x128xf32>,
    return
  }
  func.func @transform_0(%arg0: i32) -> (i32, i32) {
    %c0_i32 = arith.constant 0 : i32
    %c0_i32_0 = arith.constant 0 : i32
    return %arg0, %c0_i32 : i32, i32
  }
  func.func @transform_1(%arg0: i32) -> (i32, i32) {
    %c0_i32 = arith.constant 0 : i32
    %c0_i32_0 = arith.constant 0 : i32
    return %arg0, %c0_i32 : i32, i32
  }
  func.func @transform_2(%arg0: i32) -> (i32, i32) {
    %c0_i32 = arith.constant 0 : i32
    %c0_i32_0 = arith.constant 0 : i32
    %c0_i32_1 = arith.constant 0 : i32
    return %c0_i32, %c0_i32_0 : i32, i32
  }
  func.func @transform_3(%arg0: i32) -> (i32, i32) {
    %c0_i32 = arith.constant 0 : i32
    %c0_i32_0 = arith.constant 0 : i32
    %c0_i32_1 = arith.constant 0 : i32
    return %c0_i32, %c0_i32_0 : i32, i32
  }
  func.func @transform_4(%arg0: i32) -> (i32, i32) {
    %c0_i32 = arith.constant 0 : i32
    %c0_i32_0 = arith.constant 0 : i32
    %c0_i32_1 = arith.constant 0 : i32
    return %c0_i32, %c0_i32_0 : i32, i32
  }
  func.func @transform_5(%arg0: i32) -> (i32, i32) {
    %c0_i32 = arith.constant 0 : i32
    %c0_i32_0 = arith.constant 0 : i32
    %c0_i32_1 = arith.constant 0 : i32
    return %c0_i32, %c0_i32_0 : i32, i32
  }
  func.func @transform_6(%arg0: i32) -> (i32, i32) {
    %c0_i32 = arith.constant 0 : i32
    %c0_i32_0 = arith.constant 0 : i32
    %c0_i32_1 = arith.constant 0 : i32
    return %c0_i32, %c0_i32_0 : i32, i32
  }
  func.func @transform_7(%arg0: i32) -> (i32, i32) {
    %c0_i32 = arith.constant 0 : i32
    %c0_i32_0 = arith.constant 0 : i32
    return %arg0, %c0_i32 : i32, i32
  }
}

</mosaic_0001>

<bundles_post_ra>
// kernel: mlp_g_forward.1
= control target key start
LH: loop header
LB: loop body
LE: loop exit
PB: predicated region body
PF: predicated region fallthrough
CT: control target
= control target key end

     0   :  { %12 = vsyncpa [#allocation3], 0  ;;  %s852_s0 = inlined_call_operand.vmem [shape: f32[8,128], index: 0, kind: input, shape index: {}]   ;;  %s853_s1 = inlined_call_operand.vmem [shape: f32[8,128], index: 1, kind: input, shape index: {}]   ;;  %s854_s2 = inlined_call_operand.hbm [shape: f32[128,128], index: 2, kind: input, shape index: {}]   ;;  %s855_s3 = inlined_call_operand.hbm [shape: f32[128,128], index: 3, kind: input, shape index: {}]   ;;  %s856_s4 = inlined_call_operand.vmem [shape: f32[1,128], index: 4, kind: input, shape index: {}, may-alias: {4,6}]   ;;  %s857_s5 = inlined_call_operand.hbm [shape: f32[128,128], index: 5, kind: input, shape index: {}]   ;;  %s858_s6 = inlined_call_operand.vmem [shape: f32[1,128], index: 6, kind: input, shape index: {}, may-alias: {4,6}]   ;;  %s859_s7 = inlined_call_operand.hbm [shape: f32[8,128], index: 7, kind: output, shape index: {}]  }
   0x1   :  { %13 = vsyncpa [#allocation6], 0 }
   0x2   :  { %14 = vsyncpa [#allocation4], 0  ;;  %s697_s24 = smov [#allocation5]   ;;  %s698_s26 = smov [#allocation2]  }
   0x3   :  { %s36_s25 = sshll.u32 %s697_s24, 4  ;;  %s24_s27 = sshll.u32 %s698_s26, 4  ;;  %s37_s25 = int_to_ptr.vmem [resolvable:$true] %s36_s25  ;;  %s746_s27 = int_to_ptr.vmem [resolvable:$true] %s24_s27 }
   0x4   :  { %s603_s30 = scalar_lea.hbm %s855_s3, 2048 }
   0x5   :  { %p604_p0 = scmp.ne.s32.totalorder %s855_s3, %s603_s30  ;;  %p607_p1 = scmp.lt.u32.totalorder %s603_s30, %s855_s3 }
   0x7   :  { %p609_p2 = pnand %p607_p1, %p604_p0 }
   0x9   :  { %612 = shalt.err (!%p609_p2)
}
   0xa   :  { %s613_s12 = scalar_lea.vmem %s37_s25, 2048  ;;  %p618_p4 = scmp.lt.s32.totalorder %s37_s25, %s37_s25 }
   0xb   :  { %p614_p3 = scmp.ne.s32.totalorder %s37_s25, %s613_s12  ;;  %p619_p5 = scmp.lt.s32.totalorder %s613_s12, %s613_s12 }
   0xd   :  { %p620_p6 = por %p619_p5, %p618_p4 }
   0xf   :  { %p621_p7 = pnand %p620_p6, %p614_p3 }
  0x11   :  { %624 = shalt.err (!%p621_p7)
}
  0x12   :  { %s699_s13 = smov 128   ;;  %s700_s14 = smov 8  }
  0x13   :  { %42 = dma.hbm_to_vmem [thread:$0]  %s855_s3, 2048, %s37_s25, [#allocation6], %s699_s13, %s699_s13, %s700_s14  }
  0x14   :  { %s625_s19 = scalar_lea.hbm %s854_s2, 2048 }
  0x15   :  { %p626_p8 = scmp.ne.s32.totalorder %s854_s2, %s625_s19  ;;  %p629_p9 = scmp.lt.u32.totalorder %s625_s19, %s854_s2 }
  0x17   :  { %p631_p10 = pnand %p629_p9, %p626_p8 }
  0x19   :  { %634 = shalt.err (!%p631_p10)
}
  0x1a   :  { %s635_s24 = scalar_lea.vmem %s746_s27, 2048  ;;  %p640_p12 = scmp.lt.s32.totalorder %s746_s27, %s746_s27 }
  0x1b   :  { %p636_p11 = scmp.ne.s32.totalorder %s746_s27, %s635_s24  ;;  %p641_p13 = scmp.lt.s32.totalorder %s635_s24, %s635_s24 }
  0x1d   :  { %p642_p0 = por %p641_p13, %p640_p12 }
  0x1f   :  { %p643_p1 = pnand %p642_p0, %p636_p11 }
  0x21   :  { %646 = shalt.err (!%p643_p1)
}
  0x22   :  { %30 = dma.hbm_to_vmem [thread:$0]  %s854_s2, 2048, %s746_s27, [#allocation3], %s699_s13, %s699_s13, %s700_s14  }
  0x23   :  { %s701_s26 = smov [#allocation7]   ;;  %s647_s8 = scalar_lea.hbm %s857_s5, 2048 }
  0x24   :  { %s50_s28 = sshll.u32 %s701_s26, 4  ;;  %p648_p2 = scmp.ne.s32.totalorder %s857_s5, %s647_s8  ;;  %s51_s28 = int_to_ptr.vmem [resolvable:$true] %s50_s28 }
  0x25   :  { %p651_p3 = scmp.lt.u32.totalorder %s647_s8, %s857_s5 }
  0x27   :  { %p653_p4 = pnand %p651_p3, %p648_p2 }
  0x29   :  { %656 = shalt.err (!%p653_p4)
}
  0x2a   :  { %s657_s15 = scalar_lea.vmem %s51_s28, 2048  ;;  %p662_p6 = scmp.lt.s32.totalorder %s51_s28, %s51_s28 }
  0x2b   :  { %p658_p5 = scmp.ne.s32.totalorder %s51_s28, %s657_s15  ;;  %p663_p7 = scmp.lt.s32.totalorder %s657_s15, %s657_s15 }
  0x2d   :  { %p664_p8 = por %p663_p7, %p662_p6 }
  0x2f   :  { %p665_p9 = pnand %p664_p8, %p658_p5 }
  0x31   :  { %668 = shalt.err (!%p665_p9)
}
  0x32   :  { %56 = dma.hbm_to_vmem [thread:$0]  %s857_s5, 2048, %s51_s28, [#allocation6], %s699_s13, %s699_s13, %s700_s14  }
  0x33   :  { %691 = dma.done.wait [#allocation3], 2048  }
  0x34   :  { %692 = vsyncadd [#allocation3], 4294965248 }
  0x35   :  { %693 = dma.done.wait [#allocation6], 4096  }
  0x36   :  { %694 = vsyncadd [#allocation6], 4294963200  ;;  %v702_v0 = vmov 0.0|0.0   ;;  %vm703_vm0 = vmmov 0   ;;  %v704_v1 = vmov 0.0   ;;  %v86_v2 = vld [vmem:[#allocation5] sm:$0xff] }
  0x37   :  { %522 = vmatprep.subr.bf16.mxu0 %v702_v0  ;;  %546 = vmatprep.subr.bf16.mxu1 %v702_v0  ;;  %v87_v3 = vld [vmem:[#allocation5 + $0x8] sm:$0xff]  ;;  %v69_v4 = vld [vmem:[#allocation2] sm:$0xff]  ;;  %v88_v7 = vld [vmem:[#allocation5 + $0x10] sm:$0xff]  ;;  %s705_s19 = smov [#allocation8]  }
  0x38   :  { %449 = vmatprep.mubr.msk.f32.mxu0 %vm703_vm0, %v704_v1  ;;  %484 = vmatprep.mubr.msk.f32.mxu1 %vm703_vm0, %v704_v1  ;;  %v523_v5 = vpack.c.bf16 %v87_v3, %v86_v2  ;;  %v70_v6 = vld [vmem:[#allocation2 + $0x8] sm:$0xff]  ;;  %v89_v8 = vld [vmem:[#allocation5 + $0x18] sm:$0xff]  ;;  %v71_v10 = vld [vmem:[#allocation2 + $0x10] sm:$0xff]  ;;  %s354_s20 = sshll.u32 %s705_s19, 4  ;;  %s355_s20 = int_to_ptr.vmem [resolvable:$true] %s354_s20 }
  0x39   :  { %v547_v9 = vpack.c.bf16 %v70_v6, %v69_v4  ;;  %v72_v11 = vld [vmem:[#allocation2 + $0x18] sm:$0xff]  ;;  %v526_v12 = vpack.c.bf16 %v89_v8, %v88_v7  ;;  %v90_v14 = vld [vmem:[#allocation5 + $0x20] sm:$0xff]  ;;  %v91_v15 = vld [vmem:[#allocation5 + $0x28] sm:$0xff]  ;;  %p674_p11 = scmp.lt.s32.totalorder %s355_s20, %s355_s20 }
  0x3a   :  { %524 = vmatpush3.bf16.msra.mxu0 %v523_v5  ;;  %v550_v13 = vpack.c.bf16 %v72_v11, %v71_v10  ;;  %v73_v16 = vld [vmem:[#allocation2 + $0x20] sm:$0xff]  ;;  %v74_v17 = vld [vmem:[#allocation2 + $0x28] sm:$0xff]  ;;  %v529_v18 = vpack.c.bf16 %v91_v15, %v90_v14  ;;  %v92_v20 = vld [vmem:[#allocation5 + $0x30] sm:$0xff] }
  0x3b   :  { %548 = vmatpush3.bf16.msra.mxu1 %v547_v9  ;;  %525 = vmatprep.subr.bf16.mxu0 %v702_v0  ;;  %v553_v19 = vpack.c.bf16 %v74_v17, %v73_v16  ;;  %v93_v21 = vld [vmem:[#allocation5 + $0x38] sm:$0xff]  ;;  %v75_v22 = vld [vmem:[#allocation2 + $0x30] sm:$0xff]  ;;  %v94_v26 = vld [vmem:[#allocation5 + $0x40] sm:$0xff] }
  0x3c   :  { %549 = vmatprep.subr.bf16.mxu1 %v702_v0  ;;  %v76_v23 = vld [vmem:[#allocation2 + $0x38] sm:$0xff]  ;;  %v532_v24 = vpack.c.bf16 %v93_v21, %v92_v20  ;;  %v95_v27 = vld [vmem:[#allocation5 + $0x48] sm:$0xff]  ;;  %v77_v28 = vld [vmem:[#allocation2 + $0x40] sm:$0xff] }
  0x3d   :  { %v556_v25 = vpack.c.bf16 %v76_v23, %v75_v22  ;;  %v78_v29 = vld [vmem:[#allocation2 + $0x48] sm:$0xff]  ;;  %v535_v30 = vpack.c.bf16 %v95_v27, %v94_v26  ;;  %v96_v32 = vld [vmem:[#allocation5 + $0x50] sm:$0xff]  ;;  %v97_v33 = vld [vmem:[#allocation5 + $0x58] sm:$0xff] }
  0x3e   :  { %527 = vmatpush3.bf16.msra.mxu0 %v526_v12  ;;  %v559_v31 = vpack.c.bf16 %v78_v29, %v77_v28  ;;  %v79_v34 = vld [vmem:[#allocation2 + $0x50] sm:$0xff]  ;;  %v80_v35 = vld [vmem:[#allocation2 + $0x58] sm:$0xff]  ;;  %v538_v36 = vpack.c.bf16 %v97_v33, %v96_v32  ;;  %v98_v38 = vld [vmem:[#allocation5 + $0x60] sm:$0xff] }
  0x3f   :  { %551 = vmatpush3.bf16.msra.mxu1 %v550_v13  ;;  %528 = vmatprep.subr.bf16.mxu0 %v702_v0  ;;  %v562_v37 = vpack.c.bf16 %v80_v35, %v79_v34  ;;  %v99_v39 = vld [vmem:[#allocation5 + $0x68] sm:$0xff]  ;;  %v81_v40 = vld [vmem:[#allocation2 + $0x60] sm:$0xff]  ;;  %v100_v44 = vld [vmem:[#allocation5 + $0x70] sm:$0xff] }
  0x40   :  { %552 = vmatprep.subr.bf16.mxu1 %v702_v0  ;;  %v82_v41 = vld [vmem:[#allocation2 + $0x68] sm:$0xff]  ;;  %v541_v42 = vpack.c.bf16 %v99_v39, %v98_v38  ;;  %v101_v45 = vld [vmem:[#allocation5 + $0x78] sm:$0xff]  ;;  %v83_v46 = vld [vmem:[#allocation2 + $0x70] sm:$0xff] }
  0x41   :  { %v565_v43 = vpack.c.bf16 %v82_v41, %v81_v40  ;;  %v84_v47 = vld [vmem:[#allocation2 + $0x78] sm:$0xff]  ;;  %v544_v48 = vpack.c.bf16 %v101_v45, %v100_v44  ;;  %v253_v50 = vld [vmem:[#allocation7] sm:$0xff]  ;;  %v254_v51 = vld [vmem:[#allocation7 + $0x8] sm:$0xff] }
  0x42   :  { %530 = vmatpush3.bf16.msra.mxu0 %v529_v18  ;;  %v568_v49 = vpack.c.bf16 %v84_v47, %v83_v46  ;;  %v85_v52 = vld [vmem:[%s853_s1] sm:$0xff]  ;;  %v571_v53 = vpack.c.bf16 %v254_v51, %v253_v50  ;;  %v255_v55 = vld [vmem:[#allocation7 + $0x10] sm:$0xff]  ;;  %v256_v56 = vld [vmem:[#allocation7 + $0x18] sm:$0xff] }
  0x43   :  { %554 = vmatpush3.bf16.msra.mxu1 %v553_v19  ;;  %531 = vmatprep.subr.bf16.mxu0 %v702_v0  ;;  %v68_v54 = vld [vmem:[%s852_s0] sm:$0xff]  ;;  %v574_v57 = vpack.c.bf16 %v256_v56, %v255_v55  ;;  %v258_v59 = vld [vmem:[#allocation7 + $0x28] sm:$0xff]  ;;  %v259_v61 = vld [vmem:[#allocation7 + $0x30] sm:$0xff] }
  0x44   :  { %555 = vmatprep.subr.bf16.mxu1 %v702_v0  ;;  %v257_v58 = vld [vmem:[#allocation7 + $0x20] sm:$0xff]  ;;  %v260_v62 = vld [vmem:[#allocation7 + $0x38] sm:$0xff]  ;;  %v262_v3 = vld [vmem:[#allocation7 + $0x48] sm:$0xff] }
  0x45   :  { %v577_v60 = vpack.c.bf16 %v258_v59, %v257_v58  ;;  %v580_v63 = vpack.c.bf16 %v260_v62, %v259_v61  ;;  %v261_v2 = vld [vmem:[#allocation7 + $0x40] sm:$0xff]  ;;  %v263_v5 = vld [vmem:[#allocation7 + $0x50] sm:$0xff]  ;;  %v264_v6 = vld [vmem:[#allocation7 + $0x58] sm:$0xff] }
  0x46   :  { %533 = vmatpush3.bf16.msra.mxu0 %v532_v24  ;;  %v583_v4 = vpack.c.bf16 %v262_v3, %v261_v2  ;;  %v265_v7 = vld [vmem:[#allocation7 + $0x60] sm:$0xff]  ;;  %v266_v8 = vld [vmem:[#allocation7 + $0x68] sm:$0xff]  ;;  %v267_v10 = vld [vmem:[#allocation7 + $0x70] sm:$0xff] }
  0x47   :  { %557 = vmatpush3.bf16.msra.mxu1 %v556_v25  ;;  %534 = vmatprep.subr.bf16.mxu0 %v702_v0  ;;  %v589_v9 = vpack.c.bf16 %v266_v8, %v265_v7  ;;  %v268_v11 = vld [vmem:[#allocation7 + $0x78] sm:$0xff]  ;;  %v364_v15 = vld [vmem:[%s856_s4] ss:$0 sm:$0xff]  ;;  %s669_s4 = scalar_lea.vmem %s355_s20, 128 }
  0x48   :  { %558 = vmatprep.subr.bf16.mxu1 %v702_v0  ;;  %v592_v12 = vpack.c.bf16 %v268_v11, %v267_v10  ;;  %p670_p10 = scmp.ne.s32.totalorder %s355_s20, %s669_s4  ;;  %p675_p12 = scmp.lt.s32.totalorder %s669_s4, %s669_s4 }
  0x4a   :  { %536 = vmatpush3.bf16.msra.mxu0 %v535_v30  ;;  %p676_p13 = por %p675_p12, %p674_p11 }
  0x4b   :  { %560 = vmatpush3.bf16.msra.mxu1 %v559_v31  ;;  %537 = vmatprep.subr.bf16.mxu0 %v702_v0 }
  0x4c   :  { %561 = vmatprep.subr.bf16.mxu1 %v702_v0  ;;  %p677_p0 = pnand %p676_p13, %p670_p10 }
  0x4e   :  { %539 = vmatpush3.bf16.msra.mxu0 %v538_v36 }
  0x4f   :  { %563 = vmatpush3.bf16.msra.mxu1 %v562_v37  ;;  %540 = vmatprep.subr.bf16.mxu0 %v702_v0 }
  0x50   :  { %564 = vmatprep.subr.bf16.mxu1 %v702_v0 }
  0x52   :  { %542 = vmatpush3.bf16.msra.mxu0 %v541_v42 }
  0x53   :  { %566 = vmatpush3.bf16.msra.mxu1 %v565_v43  ;;  %543 = vmatprep.subr.bf16.mxu0 %v702_v0 }
  0x54   :  { %567 = vmatprep.subr.bf16.mxu1 %v702_v0 }
  0x56   :  { %545 = vmatpush3.bf16.msra.mxu0 %v544_v48 }
  0x57   :  { %569 = vmatpush3.bf16.msra.mxu1 %v568_v49  ;;  %570 = vmatprep.subr.bf16.mxu0 %v702_v0 }
  0x59   :  { %450 = vmatmul.mubr.f32.vlgmr.msra.gmra.mrb[0].mxu0 %v85_v52 }
  0x5a   :  { %485 = vmatmul.mubr.f32.vlgmr.msra.gmra.mrb[0].mxu1 %v68_v54  ;;  %572 = vmatpush3.bf16.msra.mxu0 %v571_v53 }
  0x5b   :  { %573 = vmatprep.subr.bf16.mxu0 %v702_v0  ;;  %519 = vmatprep.mubr.msk.f32.mxu0 %vm703_vm0, %v704_v1  ;;  %v586_v1 = vpack.c.bf16 %v264_v6, %v263_v5 }
  0x5e   :  { %575 = vmatpush3.bf16.msra.mxu0 %v574_v57 }
  0x5f   :  { %576 = vmatprep.subr.bf16.mxu0 %v702_v0 }
  0x62   :  { %578 = vmatpush3.bf16.msra.mxu0 %v577_v60 }
  0x63   :  { %579 = vmatprep.subr.bf16.mxu0 %v702_v0 }
  0x66   :  { %581 = vmatpush3.bf16.msra.mxu0 %v580_v63 }
  0x67   :  { %582 = vmatprep.subr.bf16.mxu0 %v702_v0 }
  0x6a   :  { %584 = vmatpush3.bf16.msra.mxu0 %v583_v4 }
  0x6b   :  { %585 = vmatprep.subr.bf16.mxu0 %v702_v0 }
  0x6e   :  { %587 = vmatpush3.bf16.msra.mxu0 %v586_v1 }
  0x6f   :  { %588 = vmatprep.subr.bf16.mxu0 %v702_v0 }
  0x72   :  { %590 = vmatpush3.bf16.msra.mxu0 %v589_v9 }
  0x73   :  { %591 = vmatprep.subr.bf16.mxu0 %v702_v0  ;;  %v365_v0 = vld [vmem:[%s858_s6] ss:$0 sm:$0xff] }
  0x76   :  { %593 = vmatpush3.bf16.msra.mxu0 %v592_v12 }
 0x12c   :  { %v168_v13 = vpop.f32.mrb[0].mxu0 }
 0x12d   :  { %v238_v14 = vpop.f32.mrb[0].mxu1  ;;  %v451_v16 = vpop.f32.mrb[1].mxu0 }
 0x12e   :  { %v239_v17 = vadd.f32 %v238_v14, %v168_v13  ;;  %v486_v18 = vpop.f32.mrb[1].mxu1 }
 0x130   :  { %v249_v19 = vadd.f32 %v364_v15, %v239_v17 }
 0x132   :  { %v251_v20 = vmul.f32 0.2, %v249_v19  ;;  %vm250_vm1 = vcmp.gt.f32.partialorder %v249_v19, 0.0 }
 0x134   :  { %v252_v21 = vsel %vm250_vm1, %v249_v19, %v251_v20 }
 0x135   :  { %520 = vmatmul.mubr.f32.vlgmr.msra.gmra.mrb[2].mxu0 %v252_v21 }
 0x208   :  { %v342_v22 = vpop.f32.mrb[2].mxu0 }
 0x209   :  { %v343_v23 = vadd.f32 %v365_v0, %v342_v22  ;;  %v521_v24 = vpop.f32.mrb[3].mxu0 }
 0x20b   :  { %v346_v25 = vmax.f32 %v343_v23, 0.0 }
 0x20d   :  { %347 = vst [vmem:[#allocation8] sm:$0xff] %v346_v25 }
 0x20e   :  { %680 = shalt.err (!%p677_p0)
}
 0x20f   :  { %s681_s23 = scalar_lea.hbm %s859_s7, 128 }
 0x210   :  { %p682_p1 = scmp.ne.s32.totalorder %s859_s7, %s681_s23  ;;  %p685_p2 = scmp.lt.u32.totalorder %s681_s23, %s859_s7 }
 0x212   :  { %p687_p3 = pnand %p685_p2, %p682_p1 }
 0x214   :  { %690 = shalt.err (!%p687_p3)
}
 0x215   :  { %357 = dma.vmem_to_hbm [thread:$0]  %s355_s20, 128, %s859_s7, [#allocation4]  }
 0x216   :  { %695 = dma.done.wait [#allocation4], 128  }
 0x217   :  { %696 = vsyncadd [#allocation4], 4294967168 }
 0x218   :  { %361 = vsyncpa [#allocation3], 1 }
 0x219   :  { %362 = vsyncpa [#allocation6], 1 }
 0x21a   :  { %363 = vsyncpa [#allocation4], 1 }

</bundles_post_ra>
